<compile_context>
chip_gen: v7x
topology: tpu7x:2x2x1
jax: 0.10.0
libtpu: 0.0.40
codegen_flags: <defaults>
</compile_context>

<pallas_src>
import math

import jax
import jax.numpy as jnp
from jax.experimental import pallas as pl
from jax.experimental.pallas import tpu as pltpu


def _gate_kernel(x_ref, w_ref, b_ref, o_ref):
    # x_ref/o_ref: (TM, TC) tile; w_ref/b_ref: (1, TC) broadcast rows.
    o_ref[...] = (x_ref[...] * w_ref[...] + b_ref[...]).astype(o_ref.dtype)


# ~4 MiB per tile: x + out double-buffered => ~16 MiB of VMEM, safely inside the
# 32 MiB explicit scoped limit on v5e/v6e/v7x while amortizing the ~0.35 us
# per-grid-step overhead.
_TARGET_TILE_BYTES = 4 * 1024 * 1024


def _pick_tiles(R: int, C: int, itemsize: int):
    """Pick (tm, tc): lane-dense, ~4 MiB tiles, balanced rows, VMEM-safe."""
    # Sublane packing factor for the dtype (8 f32, 16 bf16, 32 int8/fp8).
    row_mult = max(8, 32 // max(1, itemsize))

    # Column blocks: prefer full C (contiguous DMA, resident weight/bias,
    # 1-D grid).  Only split when even an 8-row full-C stripe is too big.
    if C * itemsize * row_mult <= _TARGET_TILE_BYTES:
        tc = C
    else:
        tc = max(128, (_TARGET_TILE_BYTES // (row_mult * itemsize)) // 128 * 128)

    # Row blocks: ~target bytes per tile, balanced across blocks.
    tm_target = max(row_mult, _TARGET_TILE_BYTES // max(1, tc * itemsize))
    n_rows = max(1, pl.cdiv(R, tm_target))
    # Megacore (v7x has 2 TCs): never collapse to a single block when the
    # tensor is more than one tile's worth of data.
    if n_rows == 1 and R * C * itemsize > _TARGET_TILE_BYTES and R >= 2 * row_mult:
        n_rows = 2
    tm = pl.cdiv(R, n_rows)
    tm = ((tm + row_mult - 1) // row_mult) * row_mult  # sublane-aligned
    if tm >= R:
        tm = R  # single full-extent row block (always legal, even if R < 8)
    return tm, tc


def _lane_fold_factor(R: int, C: int) -> int:
    """Fold k rows into the lane dim so the last dim becomes a multiple of 128."""
    if C <= 0 or C % 128 == 0 or R <= 1:
        return 1
    k = 128 // math.gcd(C, 128)
    if k > 1 and R % k == 0:
        return k
    return 1


def gate_forward(x: jax.Array, weight: jax.Array, bias: jax.Array) -> jax.Array:
    """y = x * weight + bias with weight/bias of shape (C,) broadcast over '...'."""
    orig_shape = x.shape
    C = orig_shape[-1]
    assert weight.shape == (C,) and bias.shape == (C,)

    R = int(math.prod(orig_shape[:-1])) if len(orig_shape) > 1 else 1

    # Empty input: nothing to compute.
    if R == 0 or C == 0:
        return jnp.reshape(x, orig_shape)

    # Cast params to the activation dtype so the kernel does no promotion.
    w = weight.astype(x.dtype)
    b = bias.astype(x.dtype)

    # Lane-density fold for small / ragged C (e.g. 32/64/96): present a last
    # dim that is a multiple of 128 so stores are unmasked full-lane vst.
    k = _lane_fold_factor(R, C)
    Rk, Ck = R // k, C * k
    x2 = x.reshape(Rk, Ck)
    w2 = jnp.tile(w, k).reshape(1, Ck)
    b2 = jnp.tile(b, k).reshape(1, Ck)

    itemsize = jnp.dtype(x.dtype).itemsize
    tm, tc = _pick_tiles(Rk, Ck, itemsize)
    n_col = pl.cdiv(Ck, tc)
    n_row = pl.cdiv(Rk, tm)
    # Column axis OUTER (slow), row axis inner (fast): weight/bias block index
    # is constant across the fast axis, so their tiles are not re-DMA'd every
    # grid step.  (n_col == 1 in the common full-C case -> effectively 1-D.)
    grid = (n_col, n_row)

    out = pl.pallas_call(
        _gate_kernel,
        out_shape=jax.ShapeDtypeStruct((Rk, Ck), x.dtype),
        grid_spec=pltpu.PrefetchScalarGridSpec(
            num_scalar_prefetch=0,
            grid=grid,
            in_specs=[
                pl.BlockSpec((tm, tc), lambda j, i: (i, j)),   # x row/col tile
                pl.BlockSpec((1, tc), lambda j, i: (0, j)),    # weight (bcast rows)
                pl.BlockSpec((1, tc), lambda j, i: (0, j)),    # bias   (bcast rows)
            ],
            out_specs=pl.BlockSpec((tm, tc), lambda j, i: (i, j)),
        ),
        compiler_params=pltpu.CompilerParams(
            dimension_semantics=("parallel", "parallel"),
            # ~16 MiB of double-buffered tiles + tiny w/b rows.  32 MiB is
            # explicit headroom over v5e's 16 MiB scoped default while staying
            # inside v7x's 64 MiB physical / 32 MiB scoped VMEM.
            vmem_limit_bytes=32 * 1024 * 1024,
        ),
    )(x2, w2, b2)

    return out.reshape(orig_shape)


def init_gate_params(key: jax.Array, C: int, dtype=jnp.float32):
    """Deterministic synthetic init matching the module's shapes.

    PyTorch's init_param_(weight, fan_val=1, nonlinearity='linear') is a
    kaiming-style uniform with fan=1  ->  U(-sqrt(3), sqrt(3)); bias = 0.
    """
    bound = math.sqrt(3.0)  # gain('linear')=1, std = 1/sqrt(fan_val)=1
    weight = jax.random.uniform(key, (C,), dtype=dtype, minval=-bound, maxval=bound)
    bias = jnp.zeros((C,), dtype=dtype)
    return weight, bias


if __name__ == "__main__":
    key = jax.random.PRNGKey(0)
    k_x, k_w, k_x2 = jax.random.split(key, 3)

    # Primary shape: leading dims (B, S), lane-dense C (full-C tile path).
    B, S, C = 2, 8, 128
    x = jax.random.normal(k_x, (B, S, C), dtype=jnp.float32)
    weight, bias = init_gate_params(k_w, C)

    y = gate_forward(x, weight, bias)
    jax.block_until_ready(y)

    y_ref = x * weight + bias
    assert y.shape == x.shape and y.dtype == x.dtype
    assert jnp.allclose(y, y_ref, atol=1e-6, rtol=1e-6)

    # Small-C shape exercising the lane-fold path (C=32 -> folded lane width 128),
    # with a nonzero bias so the add is actually checked.
    B2, S2, C2 = 4, 8, 32
    x_s = jax.random.normal(k_x2, (B2, S2, C2), dtype=jnp.float32)
    w_s, _ = init_gate_params(k_w, C2)
    b_s = jnp.linspace(-1.0, 1.0, C2, dtype=jnp.float32)

    y_s = gate_forward(x_s, w_s, b_s)
    jax.block_until_ready(y_s)

    y_s_ref = x_s * w_s + b_s
    assert y_s.shape == x_s.shape and y_s.dtype == x_s.dtype
    assert jnp.allclose(y_s, y_s_ref, atol=1e-6, rtol=1e-6)

    print("KERNEL_OK")
</pallas_src>

<mosaic_0001>
module attributes {stable_mosaic.version = 11 : i64} {
  func.func @_gate_kernel(%arg0: i32, %arg1: i32, %arg2: memref<16x128xf32, #tpu.memory_space<vmem>>, %arg3: memref<1x128xf32, #tpu.memory_space<vmem>>, %arg4: memref<1x128xf32, #tpu.memory_space<vmem>>, %arg5: memref<16x128xf32, #tpu.memory_space<vmem>>) attributes {dimension_semantics = [#tpu.dimension_semantics<parallel>, #tpu.dimension_semantics<parallel>], iteration_bounds = array<i64: 1, 1>, scalar_prefetch = 0 : i64, scratch_operands = 0 : i64, tpu.core_type = #tpu.core_type<tc>, window_params = [{transform_indices = @transform_0, window_bounds = array<i64: 16, 128>}, {transform_indices = @transform_1, window_bounds = array<i64: 1, 128>}, {transform_indices = @transform_2, window_bounds = array<i64: 1, 128>}, {transform_indices = @transform_3, window_bounds = array<i64: 16, 128>}]} {
    %c0 = arith.constant 0 : index
    %c0_0 = arith.constant 0 : index
    %0 = vector.load %arg2[%c0, %c0_0] : memref<16x128xf32, #tpu.memory_space<vmem>>, vector<16x128xf32>
    %c0_1 = arith.constant 0 : index
    %c0_2 = arith.constant 0 : index
    %1 = vector.load %arg3[%c0_1, %c0_2] : memref<1x128xf32, #tpu.memory_space<vmem>>, vector<1x128xf32>
    %2 = vector.broadcast %1 : vector<1x128xf32> to vector<16x128xf32>
    %3 = arith.mulf %0, %2 : vector<16x128xf32>
    %c0_3 = arith.constant 0 : index
    %c0_4 = arith.constant 0 : index
    %4 = vector.load %arg4[%c0_3, %c0_4] : memref<1x128xf32, #tpu.memory_space<vmem>>, vector<1x128xf32>
    %5 = vector.broadcast %4 : vector<1x128xf32> to vector<16x128xf32>
    %6 = arith.addf %3, %5 : vector<16x128xf32>
    %c0_5 = arith.constant 0 : index
    %c0_6 = arith.constant 0 : index
    %7 = vector.load %arg5[%c0_5, %c0_6] : memref<16x128xf32, #tpu.memory_space<vmem>>, vector<16x128xf32>
    tpu.vector_store %arg5[%c0_5, %c0_6], %6 {strides = array<i32>} : memref<16x128xf32, #tpu.memory_space<vmem>>, vector<16x128xf32>,
    return
  }
  func.func @transform_0(%arg0: i32, %arg1: i32) -> (i32, i32) {
    %c0_i32 = arith.constant 0 : i32
    return %arg1, %arg0 : i32, i32
  }
  func.func @transform_1(%arg0: i32, %arg1: i32) -> (i32, i32) {
    %c0_i32 = arith.constant 0 : i32
    %c0_i32_0 = arith.constant 0 : i32
    return %c0_i32, %arg0 : i32, i32
  }
  func.func @transform_2(%arg0: i32, %arg1: i32) -> (i32, i32) {
    %c0_i32 = arith.constant 0 : i32
    %c0_i32_0 = arith.constant 0 : i32
    return %c0_i32, %arg0 : i32, i32
  }
  func.func @transform_3(%arg0: i32, %arg1: i32) -> (i32, i32) {
    %c0_i32 = arith.constant 0 : i32
    return %arg1, %arg0 : i32, i32
  }
}

</mosaic_0001>

<bundles_post_ra>
// kernel: tpu_custom_call.1
= control target key start
LH: loop header
LB: loop body
LE: loop exit
PB: predicated region body
PF: predicated region fallthrough
CT: control target
= control target key end

     0   :  { %8 = vsyncpa [#allocation3], 0  ;;  %s182_s0 = inlined_call_operand.hbm [shape: f32[16,128], index: 0, kind: input, shape index: {}]   ;;  %s183_s1 = inlined_call_operand.vmem [shape: f32[1,128], index: 1, kind: input, shape index: {}]   ;;  %s184_s2 = inlined_call_operand.vmem [shape: f32[1,128], index: 2, kind: input, shape index: {}]   ;;  %s185_s3 = inlined_call_operand.hbm [shape: f32[16,128], index: 3, kind: output, shape index: {}]  }
   0x1   :  { %9 = vsyncpa [#allocation4], 0  ;;  %s122_s12 = smov [#allocation2]   ;;  %s74_s16 = scalar_lea.hbm %s182_s0, 256 }
   0x2   :  { %s15_s13 = sshll.u32 %s122_s12, 4  ;;  %p75_p0 = scmp.ne.s32.totalorder %s182_s0, %s74_s16  ;;  %s16_s13 = int_to_ptr.vmem [resolvable:$true] %s15_s13 }
   0x3   :  { %p78_p1 = scmp.lt.u32.totalorder %s74_s16, %s182_s0 }
   0x5   :  { %p80_p2 = pnand %p78_p1, %p75_p0 }
   0x7   :  { %83 = shalt.err (!%p80_p2)
}
   0x8   :  { %s84_s21 = scalar_lea.vmem %s16_s13, 256  ;;  %p89_p4 = scmp.lt.s32.totalorder %s16_s13, %s16_s13 }
   0x9   :  { %p85_p3 = scmp.ne.s32.totalorder %s16_s13, %s84_s21  ;;  %p90_p5 = scmp.lt.s32.totalorder %s84_s21, %s84_s21 }
   0xb   :  { %p91_p6 = por %p90_p5, %p89_p4 }
   0xd   :  { %p92_p7 = pnand %p91_p6, %p85_p3 }
   0xf   :  { %95 = shalt.err (!%p92_p7)
}
  0x10   :  { %s123_s22 = smov 128   ;;  %s124_s23 = smov 8  }
  0x11   :  { %21 = dma.hbm_to_vmem [thread:$0]  %s182_s0, 256, %s16_s13, [#allocation3], %s123_s22, %s123_s22, %s124_s23  }
  0x12   :  { %118 = dma.done.wait [#allocation3], 256  }
  0x13   :  { %119 = vsyncadd [#allocation3], 4294967040  ;;  %v29_v0 = vld [vmem:[#allocation2] sm:$0xff]  ;;  %v30_v4 = vld [vmem:[#allocation2 + $0x8] sm:$0xff]  ;;  %s125_s30 = smov [#allocation5]  }
  0x14   :  { %v68_v1 = vld [vmem:[%s183_s1] ss:$0 sm:$0xff]  ;;  %s56_s4 = sshll.u32 %s125_s30, 4  ;;  %s57_s4 = int_to_ptr.vmem [resolvable:$true] %s56_s4 }
  0x15   :  { %v69_v2 = vld [vmem:[%s184_s2] ss:$0 sm:$0xff]  ;;  %v38_v3 = vmul.f32 %v68_v1, %v29_v0  ;;  %v39_v5 = vmul.f32 %v68_v1, %v30_v4  ;;  %s96_s0 = scalar_lea.vmem %s57_s4, 256  ;;  %p101_p9 = scmp.lt.s32.totalorder %s57_s4, %s57_s4 }
  0x16   :  { %p97_p8 = scmp.ne.s32.totalorder %s57_s4, %s96_s0  ;;  %p102_p10 = scmp.lt.s32.totalorder %s96_s0, %s96_s0 }
  0x17   :  { %v47_v6 = vadd.f32 %v69_v2, %v38_v3  ;;  %v48_v7 = vadd.f32 %v69_v2, %v39_v5 }
  0x18   :  { %p103_p11 = por %p102_p10, %p101_p9 }
  0x19   :  { %49 = vst [vmem:[#allocation5] sm:$0xff] %v47_v6  ;;  %50 = vst [vmem:[#allocation5 + $0x8] sm:$0xff] %v48_v7 }
  0x1a   :  { %p104_p12 = pnand %p103_p11, %p97_p8 }
  0x1c   :  { %107 = shalt.err (!%p104_p12)
}
  0x1d   :  { %s108_s2 = scalar_lea.hbm %s185_s3, 256 }
  0x1e   :  { %p109_p13 = scmp.ne.s32.totalorder %s185_s3, %s108_s2  ;;  %p112_p0 = scmp.lt.u32.totalorder %s108_s2, %s185_s3 }
  0x20   :  { %p114_p1 = pnand %p112_p0, %p109_p13 }
  0x22   :  { %117 = shalt.err (!%p114_p1)
}
  0x23   :  { %62 = dma.vmem_to_hbm [thread:$0]  %s57_s4, 256, %s185_s3, [#allocation4], %s123_s22, %s123_s22, %s124_s23  }
  0x24   :  { %120 = dma.done.wait [#allocation4], 256  }
  0x25   :  { %121 = vsyncadd [#allocation4], 4294967040 }
  0x26   :  { %66 = vsyncpa [#allocation3], 1 }
  0x27   :  { %67 = vsyncpa [#allocation4], 1 }

</bundles_post_ra>
